<compile_context>
chip_gen: v5e
topology: v5e:2x2
jax: 0.10.0
libtpu: 0.0.40
codegen_flags: <defaults>
</compile_context>

<pallas_src>
import functools

import jax
import jax.numpy as jnp
from jax import lax
from jax.experimental import pallas as pl
from jax.experimental.pallas import tpu as pltpu

N, C, H, W = 2, 4, 16, 16          # batch, channel, height, width
K = 3                              # conv kernel size
PAD = 1                            # conv padding (stride 1)
EPS = 1e-5                         # nn.BatchNorm2d default eps

R = N * C                          # 8   sublane rows:  r = n*C + c
P = H * W                          # 256 lane columns:  p = h*W + w
TAPS = K * K                       # 9

_VMEM = pl.BlockSpec(memory_space=pltpu.MemorySpace.VMEM)


# ----------------------------------------------------------------------------
# Kernel
# ----------------------------------------------------------------------------
def _tap(a, dh, dw, mask, roll_like_jnp):
    """Shifted (and boundary-masked) view of `a` for conv tap (dh, dw).

    result[:, p] = a[:, p + dh*W + dw] where in-bounds, else 0.  The center
    tap (dh == dw == 0) has mask None and is returned untouched (no roll, no
    select).
    """
    s = dh * W + dw
    if s == 0:
        shifted = a
    else:
        amt = (-s) % P if roll_like_jnp else s % P
        shifted = pltpu.roll(a, amt, axis=1)
    if mask is None:
        return shifted
    return jnp.where(mask, shifted, 0.0)


def _conv3x3(a, w_ref, b_ref, tap_specs, cols_ref, roll_like_jnp):
    """3x3 stride-1 same-padding conv as ONE matmul on an im2col slab.

    a: (R, P) activation.  w_ref: (R, TAPS*R) block-diagonal weights.
    cols_ref: (TAPS*R, P) VMEM scratch; every tap is written at a
    sublane-aligned offset (multiple of 8), full lane width -> no relayouts.
    tap_specs: hoisted list of (dh, dw, mask) shared by both convs.
    """
    for tap, (dh, dw, mask) in enumerate(tap_specs):
        cols_ref[tap * R:(tap + 1) * R, :] = _tap(a, dh, dw, mask, roll_like_jnp)
    return jnp.dot(w_ref[...], cols_ref[...],
                   preferred_element_type=jnp.float32) + b_ref[...]


def _batchnorm(y, g_ref, be_ref):
    """Training-mode BatchNorm2d, single pass (sum & sum-of-squares).

    Reduce over lanes FIRST, then pair the two batch rows of each channel with
    a sublane roll of the (R,1) column (rows r and r^C hold the same channel
    for the other batch element; C == R-C so the roll direction is moot).
    """
    rs = jnp.sum(y, axis=1, keepdims=True)           # (R,1)
    rq = jnp.sum(y * y, axis=1, keepdims=True)       # (R,1)
    s1 = rs + pltpu.roll(rs, C, axis=0)              # per-channel sum (both batches)
    s2 = rq + pltpu.roll(rq, C, axis=0)
    inv_cnt = 1.0 / float(N * H * W)
    mean = s1 * inv_cnt
    var = s2 * inv_cnt - mean * mean
    scale = g_ref[...] * lax.rsqrt(var + EPS)        # (R,1)
    shift = be_ref[...] - mean * scale               # fold affine: 2 full-width ops
    return y * scale + shift


def resnet_block_kernel(x_ref, w1_ref, b1_ref, g1_ref, be1_ref,
                        w2_ref, b2_ref, g2_ref, be2_ref, out_ref, cols_ref,
                        *, roll_like_jnp):
    x = x_ref[...]                                              # (8, 256)

    # ---- Elementary boundary masks: built ONCE, reused by both convs. ----
    lane = lax.broadcasted_iota(jnp.int32, (R, P), 1)
    h_idx = lane // W
    w_idx = lane % W
    h_ge = h_idx >= 1          # valid when dh == -1
    h_le = h_idx <= H - 2      # valid when dh == +1
    w_ge = w_idx >= 1          # valid when dw == -1
    w_le = w_idx <= W - 2      # valid when dw == +1

    def combine(dh, dw):
        ms = []
        if dh == -1:
            ms.append(h_ge)
        elif dh == 1:
            ms.append(h_le)
        if dw == -1:
            ms.append(w_ge)
        elif dw == 1:
            ms.append(w_le)
        if not ms:
            return None                      # center tap / interior: no select
        m = ms[0]
        for e in ms[1:]:
            m = m & e
        return m

    tap_specs = [(kh - PAD, kw - PAD, combine(kh - PAD, kw - PAD))
                 for kh in range(K) for kw in range(K)]

    # conv1 -> BN1 -> ReLU
    y = _batchnorm(_conv3x3(x, w1_ref, b1_ref, tap_specs, cols_ref,
                            roll_like_jnp), g1_ref, be1_ref)
    y = jnp.maximum(y, 0.0)

    # conv2 -> BN2 -> residual add (lane-dense (8, 256) store)
    y = _batchnorm(_conv3x3(y, w2_ref, b2_ref, tap_specs, cols_ref,
                            roll_like_jnp), g2_ref, be2_ref)
    out_ref[...] = x + y


# ----------------------------------------------------------------------------
# One-time probe: pltpu.roll lane-shift sign convention (guards correctness of
# the _tap shift sign; runs once at first call — init-latency only, so it is
# kept for robustness rather than hard-coding the convention).
# ----------------------------------------------------------------------------
_ROLL_LIKE_JNP = None


def _roll_like_jnp_semantics() -> bool:
    global _ROLL_LIKE_JNP
    if _ROLL_LIKE_JNP is None:
        def probe(x_ref, o_ref):
            o_ref[...] = pltpu.roll(x_ref[...], 1, axis=1)
        x = jnp.broadcast_to(jnp.arange(128, dtype=jnp.int32), (8, 128))
        out = pl.pallas_call(
            probe,
            out_shape=jax.ShapeDtypeStruct((8, 128), jnp.int32),
            in_specs=[_VMEM], out_specs=_VMEM)(x)
        # jnp.roll convention: element 0 lands at index 1.
        _ROLL_LIKE_JNP = bool(int(out[0, 1]) == 0)
    return _ROLL_LIKE_JNP


# ----------------------------------------------------------------------------
# Wrapper (all parameter prep is tiny and fused under jit)
# ----------------------------------------------------------------------------
def _block_weight(w_oihw):
    """OIHW (co,ci,kh,kw) -> (R, TAPS*R) block weight for the im2col matmul:
       Wblk[n*C+co, tap*R + m*C + ci] = w[co,ci,kh,kw] * (n == m), tap=kh*K+kw."""
    w_t = jnp.transpose(w_oihw.astype(jnp.float32), (2, 3, 0, 1)).reshape(TAPS, C, C)
    eye = jnp.eye(N, dtype=jnp.float32)
    return jnp.einsum('nm,tij->nitmj', eye, w_t).reshape(R, TAPS * R)


def _per_row(v):
    """Per-channel (C,) parameter -> (R, 1) column replicated over the N batch rows."""
    return jnp.tile(v.astype(jnp.float32), (N,)).reshape(R, 1)


@functools.partial(jax.jit, static_argnums=(2,))
def _forward_impl(x_nchw, params, roll_like_jnp):
    x2d = x_nchw.astype(jnp.float32).reshape(R, P)   # free view of NCHW (no pad/transpose)
    kernel = functools.partial(resnet_block_kernel, roll_like_jnp=roll_like_jnp)
    out2d = pl.pallas_call(
        kernel,
        out_shape=jax.ShapeDtypeStruct((R, P), jnp.float32),
        in_specs=[_VMEM] * 9,
        out_specs=_VMEM,
        scratch_shapes=[pltpu.VMEM((TAPS * R, P), jnp.float32)],   # im2col slab
    )(x2d,
      _block_weight(params["w1"]), _per_row(params["b1"]),
      _per_row(params["g1"]), _per_row(params["be1"]),
      _block_weight(params["w2"]), _per_row(params["b2"]),
      _per_row(params["g2"]), _per_row(params["be2"]))
    return out2d.reshape(N, C, H, W)


def resnet_block_forward(x_nchw, params):
    return _forward_impl(x_nchw, params, _roll_like_jnp_semantics())


# ----------------------------------------------------------------------------
# Pure-JAX NCHW reference mirroring the PyTorch module (training-mode BN)
# ----------------------------------------------------------------------------
def ref_forward(x, p):
    def conv(a, w, b):
        y = lax.conv_general_dilated(a, w, (1, 1), [(PAD, PAD), (PAD, PAD)],
                                     dimension_numbers=("NCHW", "OIHW", "NCHW"))
        return y + b[None, :, None, None]

    def bn(a, g, be):
        mean = jnp.mean(a, axis=(0, 2, 3), keepdims=True)
        var = jnp.mean((a - mean) ** 2, axis=(0, 2, 3), keepdims=True)
        return (a - mean) / jnp.sqrt(var + EPS) * g[None, :, None, None] \
               + be[None, :, None, None]

    y = jnp.maximum(bn(conv(x, p["w1"], p["b1"]), p["g1"], p["be1"]), 0.0)
    y = bn(conv(y, p["w2"], p["b2"]), p["g2"], p["be2"])
    return x + y


if __name__ == "__main__":
    key = jax.random.PRNGKey(0)
    kx, k1, kb1, k2, kb2 = jax.random.split(key, 5)
    x = jax.random.normal(kx, (N, C, H, W), jnp.float32)      # PyTorch NCHW input
    params = {
        "w1": 0.1 * jax.random.normal(k1, (C, C, K, K), jnp.float32),   # OIHW
        "b1": 0.1 * jax.random.normal(kb1, (C,), jnp.float32),
        "g1": jnp.ones((C,), jnp.float32),                              # BN weight
        "be1": jnp.zeros((C,), jnp.float32),                            # BN bias
        "w2": 0.1 * jax.random.normal(k2, (C, C, K, K), jnp.float32),
        "b2": 0.1 * jax.random.normal(kb2, (C,), jnp.float32),
        "g2": jnp.ones((C,), jnp.float32),
        "be2": jnp.zeros((C,), jnp.float32),
    }

    out = jax.block_until_ready(resnet_block_forward(x, params))
    ref = jax.block_until_ready(ref_forward(x, params))
    assert out.shape == (N, C, H, W)
    err = float(jnp.max(jnp.abs(out - ref)))
    assert jnp.allclose(out, ref, rtol=2e-3, atol=2e-3), err
    print("KERNEL_OK")
</pallas_src>

<mosaic_0001>
module attributes {stable_mosaic.version = 11 : i64} {
  func.func @probe(%arg0: memref<8x128xi32, #tpu.memory_space<vmem>>, %arg1: memref<8x128xi32, #tpu.memory_space<vmem>>) attributes {dimension_semantics = [], scalar_prefetch = 0 : i64, scratch_operands = 0 : i64, tpu.core_type = #tpu.core_type<tc>} {
    %c0 = arith.constant 0 : index
    %c0_0 = arith.constant 0 : index
    %0 = vector.load %arg0[%c0, %c0_0] : memref<8x128xi32, #tpu.memory_space<vmem>>, vector<8x128xi32>
    %c1_i32 = arith.constant 1 : i32
    %1 = tpu.dynamic_rotate %0 by %c1_i32 dim 1 : vector<8x128xi32>, i32 -> vector<8x128xi32>
    %c0_1 = arith.constant 0 : index
    %c0_2 = arith.constant 0 : index
    %2 = vector.load %arg1[%c0_1, %c0_2] : memref<8x128xi32, #tpu.memory_space<vmem>>, vector<8x128xi32>
    tpu.vector_store %arg1[%c0_1, %c0_2], %1 {strides = array<i32>} : memref<8x128xi32, #tpu.memory_space<vmem>>, vector<8x128xi32>,
    return
  }
}

</mosaic_0001>

<bundles_post_ra>
// kernel: tpu_custom_call.1
= control target key start
LH: loop header
LB: loop body
LE: loop exit
PB: predicated region body
PF: predicated region fallthrough
CT: control target
= control target key end

     0   :  { %6 = vsyncpa [#allocation3], 0  ;;  %s118_s0 = inlined_call_operand.hbm [shape: s32[8,128], index: 0, kind: input, shape index: {}]   ;;  %s119_s1 = inlined_call_operand.hbm [shape: s32[8,128], index: 1, kind: output, shape index: {}]  }
   0x1   :  { %7 = vsyncpa [#allocation4], 0  ;;  %s13_s8 = sshll.u32 %s118_s0, 4  ;;  %s99_s9 = smov [#allocation2]   ;;  %s14_s8 = int_to_ptr.hbm [resolvable:$true] %s13_s8 }
   0x2   :  { %s15_s10 = sshll.u32 %s99_s9, 4  ;;  %s16_s10 = int_to_ptr.vmem [resolvable:$true] %s15_s10 }
   0x3   :  { %18 = dma.hbm_to_vmem [thread:$0]  %s14_s8, 128, %s16_s10, [#allocation3]  }
   0x4   :  { %95 = dma.done.wait [#allocation3], 128  }
   0x5   :  { %96 = vsyncadd [#allocation3], 4294967168  ;;  %v23_v0 = vld [vmem:[#allocation2] sm:$0xff]  ;;  %s100_s11 = smov 1   ;;  %s101_s12 = smov [#allocation5]  }
   0x6   :  { %24 = vrot.lane.b32.xlu0 %v23_v0, %s100_s11  ;;  %s32_s13 = sshll.u32 %s101_s12, 4  ;;  %s34_s16 = sshll.u32 %s119_s1, 4  ;;  %s33_s13 = int_to_ptr.vmem [resolvable:$true] %s32_s13  ;;  %s35_s16 = int_to_ptr.hbm [resolvable:$true] %s34_s16 }
  0x78   :  { %v25_v1 = vpop.permute.xlu0 %24 }
  0x79   :  { %26 = vst [vmem:[#allocation5] sm:$0xff] %v25_v1 }
  0x7a   :  { %37 = dma.vmem_to_hbm [thread:$0]  %s33_s13, 128, %s35_s16, [#allocation4]  }
  0x7b   :  { %97 = dma.done.wait [#allocation4], 128  }
  0x7c   :  { %98 = vsyncadd [#allocation4], 4294967168 }
  0x7d   :  { %42 = vsyncpa [#allocation3], 1 }
  0x7e   :  { %43 = vsyncpa [#allocation4], 1 }

</bundles_post_ra>
